<compile_context>
chip_gen: v6e
topology: v6e:2x2x1
jax: 0.10.0
libtpu: 0.0.40
codegen_flags: <defaults>
</compile_context>

<pallas_src>
import jax
import jax.numpy as jnp
from jax.experimental import pallas as pl
from jax.experimental.pallas import tpu as pltpu


def _round_up(x, m):
    return ((x + m - 1) // m) * m


def _outconv_vpu_kernel(w_ref, b_ref, x_ref, o_ref):
    """Small-channel path: channel mix as VPU FMAs; weights/bias in SMEM.

    w_ref: (Cout, Cin) SMEM   b_ref: (Cout, 1) SMEM
    x_ref: (1, Cin, TILE_M) VMEM   o_ref: (1, Cout, TILE_M) VMEM
    """
    cout, cin = w_ref.shape
    x = x_ref[0]                                   # (Cin, TILE_M), lane-dense
    for co in range(cout):                         # static unroll: Cout tiny
        acc = x[0:1, :] * w_ref[co, 0] + b_ref[co, 0]
        for ci in range(1, cin):                   # static unroll: Cin tiny
            acc = acc + x[ci:ci + 1, :] * w_ref[co, ci]
        o_ref[0, co:co + 1, :] = acc.astype(o_ref.dtype)


def _outconv_mxu_kernel(w_ref, b_ref, x_ref, o_ref):
    """General path (larger Cin/Cout): MXU matmul, weights/bias in VMEM.

    w_ref: (Cout, Cin)   b_ref: (Cout, 1)
    x_ref: (1, Cin, TILE_M)   o_ref: (1, Cout, TILE_M)
    """
    acc = jnp.dot(w_ref[...], x_ref[0], preferred_element_type=jnp.float32)
    o_ref[0] = (acc + b_ref[...]).astype(o_ref.dtype)


def _pick_tile_m(hw, cin, cout, budget_bytes=1 << 20):
    """Lane-tile size: multiple of 128, ~1 MiB per-step (in+out) footprint.

    Keeps the double-buffered VMEM usage to a few MiB on every generation
    (well under the 32 MiB scoped / 64 MiB physical limit on v7x).
    """
    cols = budget_bytes // ((cin + cout) * 4)
    cols = max(128, (cols // 128) * 128)
    return min(_round_up(hw, 128), cols)


def outconv_forward(x_nchw, weight, bias, *, tile_m=None):
    """1x1 Conv2d forward, NCHW in / NCHW out (matches nn.Conv2d(k=1)).

    x_nchw: (N, Cin, H, W) f32
    weight: (Cout, Cin, 1, 1) f32 (PyTorch layout)
    bias:   (Cout,) f32
    """
    N, Cin, H, W = x_nchw.shape
    Cout = weight.shape[0]
    HW = H * W

    if tile_m is None:
        tile_m = _pick_tile_m(HW, Cin, Cout)
    HW_pad = _round_up(HW, tile_m)
    grid_m = HW_pad // tile_m

    # Pure reshape (no transpose): NCHW -> (N, Cin, H*W); M is the lane axis.
    x3 = x_nchw.reshape(N, Cin, HW)
    if HW_pad != HW:
        x3 = jnp.pad(x3, ((0, 0), (0, 0), (0, HW_pad - HW)))

    w_mat = weight[:, :, 0, 0].astype(jnp.float32)       # (Cout, Cin)
    b_col = bias.reshape(Cout, 1).astype(jnp.float32)    # (Cout, 1)

    small = (Cin <= 32) and (Cout <= 32)
    if small:
        kernel = _outconv_vpu_kernel
        # Tiny parameter tensors live in SMEM: scalar reads, no per-step DMA
        # competing with the X/Y VMEM streams.
        w_spec = pl.BlockSpec(memory_space=pltpu.MemorySpace.SMEM)
        b_spec = pl.BlockSpec(memory_space=pltpu.MemorySpace.SMEM)
    else:
        kernel = _outconv_mxu_kernel
        w_spec = pl.BlockSpec((Cout, Cin), lambda n, m: (0, 0))
        b_spec = pl.BlockSpec((Cout, 1), lambda n, m: (0, 0))

    out3 = pl.pallas_call(
        kernel,
        out_shape=jax.ShapeDtypeStruct((N, Cout, HW_pad), jnp.float32),
        grid_spec=pltpu.PrefetchScalarGridSpec(
            num_scalar_prefetch=0,
            grid=(N, grid_m),
            in_specs=[
                w_spec,
                b_spec,
                pl.BlockSpec((1, Cin, tile_m), lambda n, m: (n, 0, m)),
            ],
            out_specs=pl.BlockSpec((1, Cout, tile_m), lambda n, m: (n, 0, m)),
        ),
        compiler_params=pltpu.CompilerParams(
            # No reduction axis: both batch and M tiles are independent, so
            # mark them parallel (2-TensorCore sharding on v7x).
            dimension_semantics=("parallel", "parallel"),
            vmem_limit_bytes=32 * 1024 * 1024,
        ),
    )(w_mat, b_col, x3)

    if HW_pad != HW:
        out3 = out3[:, :, :HW]
    return out3.reshape(N, Cout, H, W)


if __name__ == "__main__":
    key = jax.random.PRNGKey(0)
    kx, kw, kb = jax.random.split(key, 3)

    N, Cin, Cout, H, W = 2, 4, 3, 16, 16

    x = jax.random.normal(kx, (N, Cin, H, W), dtype=jnp.float32)
    # Deterministic synthetic Conv2d(in=4, out=3, kernel_size=1) parameters.
    weight = jax.random.normal(kw, (Cout, Cin, 1, 1), dtype=jnp.float32) * 0.1
    bias = jax.random.normal(kb, (Cout,), dtype=jnp.float32) * 0.1

    y = outconv_forward(x, weight, bias)
    jax.block_until_ready(y)

    # Reference: plain-JAX 1x1 conv semantics (same as PyTorch Conv2d k=1).
    y_ref = (jnp.einsum("nchw,oc->nohw", x, weight[:, :, 0, 0])
             + bias[None, :, None, None])
    assert y.shape == (N, Cout, H, W)
    assert jnp.allclose(y, y_ref, atol=1e-5, rtol=1e-5)

    print("KERNEL_OK")
</pallas_src>

<mosaic_0001>
module attributes {stable_mosaic.version = 11 : i64} {
  func.func @_outconv_vpu_kernel(%arg0: i32, %arg1: i32, %arg2: memref<3x4xf32, #tpu.memory_space<smem>>, %arg3: memref<3x1xf32, #tpu.memory_space<smem>>, %arg4: memref<1x4x256xf32, #tpu.memory_space<vmem>>, %arg5: memref<1x3x256xf32, #tpu.memory_space<vmem>>) attributes {dimension_semantics = [#tpu.dimension_semantics<parallel>, #tpu.dimension_semantics<parallel>], iteration_bounds = array<i64: 2, 1>, scalar_prefetch = 0 : i64, scratch_operands = 0 : i64, tpu.core_type = #tpu.core_type<tc>, window_params = [{transform_indices = @transform_0, window_bounds = array<i64: 3, 4>}, {transform_indices = @transform_1, window_bounds = array<i64: 3, 1>}, {transform_indices = @transform_2, window_bounds = array<i64: 1, 4, 256>}, {transform_indices = @transform_3, window_bounds = array<i64: 1, 3, 256>}]} {
    %c0 = arith.constant 0 : index
    %c0_0 = arith.constant 0 : index
    %c0_1 = arith.constant 0 : index
    %0 = vector.load %arg4[%c0, %c0_0, %c0_1] : memref<1x4x256xf32, #tpu.memory_space<vmem>>, vector<1x4x256xf32>
    %1 = vector.shape_cast %0 : vector<1x4x256xf32> to vector<4x256xf32>
    %2 = vector.extract_strided_slice %1 {offsets = [0, 0], sizes = [1, 256], strides = [1, 1]} : vector<4x256xf32> to vector<1x256xf32>
    %c0_2 = arith.constant 0 : index
    %c0_3 = arith.constant 0 : index
    %3 = memref.load %arg2[%c0_2, %c0_3] : memref<3x4xf32, #tpu.memory_space<smem>>
    %4 = vector.broadcast %3 : f32 to vector<1x256xf32>
    %5 = arith.mulf %2, %4 : vector<1x256xf32>
    %c0_4 = arith.constant 0 : index
    %c0_5 = arith.constant 0 : index
    %6 = memref.load %arg3[%c0_4, %c0_5] : memref<3x1xf32, #tpu.memory_space<smem>>
    %7 = vector.broadcast %6 : f32 to vector<1x256xf32>
    %8 = arith.addf %5, %7 : vector<1x256xf32>
    %9 = vector.extract_strided_slice %1 {offsets = [1, 0], sizes = [1, 256], strides = [1, 1]} : vector<4x256xf32> to vector<1x256xf32>
    %c0_6 = arith.constant 0 : index
    %c1 = arith.constant 1 : index
    %10 = memref.load %arg2[%c0_6, %c1] : memref<3x4xf32, #tpu.memory_space<smem>>
    %11 = vector.broadcast %10 : f32 to vector<1x256xf32>
    %12 = arith.mulf %9, %11 : vector<1x256xf32>
    %13 = arith.addf %8, %12 : vector<1x256xf32>
    %14 = vector.extract_strided_slice %1 {offsets = [2, 0], sizes = [1, 256], strides = [1, 1]} : vector<4x256xf32> to vector<1x256xf32>
    %c0_7 = arith.constant 0 : index
    %c2 = arith.constant 2 : index
    %15 = memref.load %arg2[%c0_7, %c2] : memref<3x4xf32, #tpu.memory_space<smem>>
    %16 = vector.broadcast %15 : f32 to vector<1x256xf32>
    %17 = arith.mulf %14, %16 : vector<1x256xf32>
    %18 = arith.addf %13, %17 : vector<1x256xf32>
    %19 = vector.extract_strided_slice %1 {offsets = [3, 0], sizes = [1, 256], strides = [1, 1]} : vector<4x256xf32> to vector<1x256xf32>
    %c0_8 = arith.constant 0 : index
    %c3 = arith.constant 3 : index
    %20 = memref.load %arg2[%c0_8, %c3] : memref<3x4xf32, #tpu.memory_space<smem>>
    %21 = vector.broadcast %20 : f32 to vector<1x256xf32>
    %22 = arith.mulf %19, %21 : vector<1x256xf32>
    %23 = arith.addf %18, %22 : vector<1x256xf32>
    %c0_9 = arith.constant 0 : index
    %c0_10 = arith.constant 0 : index
    %c0_11 = arith.constant 0 : index
    %24 = vector.load %arg5[%c0_9, %c0_10, %c0_11] : memref<1x3x256xf32, #tpu.memory_space<vmem>>, vector<1x1x256xf32>
    %25 = vector.shape_cast %24 : vector<1x1x256xf32> to vector<1x256xf32>
    %26 = vector.shape_cast %23 : vector<1x256xf32> to vector<1x1x256xf32>
    tpu.vector_store %arg5[%c0_9, %c0_10, %c0_11], %26 {strides = array<i32>} : memref<1x3x256xf32, #tpu.memory_space<vmem>>, vector<1x1x256xf32>,
    %27 = vector.extract_strided_slice %1 {offsets = [0, 0], sizes = [1, 256], strides = [1, 1]} : vector<4x256xf32> to vector<1x256xf32>
    %c1_12 = arith.constant 1 : index
    %c0_13 = arith.constant 0 : index
    %28 = memref.load %arg2[%c1_12, %c0_13] : memref<3x4xf32, #tpu.memory_space<smem>>
    %29 = vector.broadcast %28 : f32 to vector<1x256xf32>
    %30 = arith.mulf %27, %29 : vector<1x256xf32>
    %c1_14 = arith.constant 1 : index
    %c0_15 = arith.constant 0 : index
    %31 = memref.load %arg3[%c1_14, %c0_15] : memref<3x1xf32, #tpu.memory_space<smem>>
    %32 = vector.broadcast %31 : f32 to vector<1x256xf32>
    %33 = arith.addf %30, %32 : vector<1x256xf32>
    %34 = vector.extract_strided_slice %1 {offsets = [1, 0], sizes = [1, 256], strides = [1, 1]} : vector<4x256xf32> to vector<1x256xf32>
    %c1_16 = arith.constant 1 : index
    %c1_17 = arith.constant 1 : index
    %35 = memref.load %arg2[%c1_16, %c1_17] : memref<3x4xf32, #tpu.memory_space<smem>>
    %36 = vector.broadcast %35 : f32 to vector<1x256xf32>
    %37 = arith.mulf %34, %36 : vector<1x256xf32>
    %38 = arith.addf %33, %37 : vector<1x256xf32>
    %39 = vector.extract_strided_slice %1 {offsets = [2, 0], sizes = [1, 256], strides = [1, 1]} : vector<4x256xf32> to vector<1x256xf32>
    %c1_18 = arith.constant 1 : index
    %c2_19 = arith.constant 2 : index
    %40 = memref.load %arg2[%c1_18, %c2_19] : memref<3x4xf32, #tpu.memory_space<smem>>
    %41 = vector.broadcast %40 : f32 to vector<1x256xf32>
    %42 = arith.mulf %39, %41 : vector<1x256xf32>
    %43 = arith.addf %38, %42 : vector<1x256xf32>
    %44 = vector.extract_strided_slice %1 {offsets = [3, 0], sizes = [1, 256], strides = [1, 1]} : vector<4x256xf32> to vector<1x256xf32>
    %c1_20 = arith.constant 1 : index
    %c3_21 = arith.constant 3 : index
    %45 = memref.load %arg2[%c1_20, %c3_21] : memref<3x4xf32, #tpu.memory_space<smem>>
    %46 = vector.broadcast %45 : f32 to vector<1x256xf32>
    %47 = arith.mulf %44, %46 : vector<1x256xf32>
    %48 = arith.addf %43, %47 : vector<1x256xf32>
    %c0_22 = arith.constant 0 : index
    %c1_23 = arith.constant 1 : index
    %c0_24 = arith.constant 0 : index
    %49 = vector.load %arg5[%c0_22, %c1_23, %c0_24] : memref<1x3x256xf32, #tpu.memory_space<vmem>>, vector<1x1x256xf32>
    %50 = vector.shape_cast %49 : vector<1x1x256xf32> to vector<1x256xf32>
    %51 = vector.shape_cast %48 : vector<1x256xf32> to vector<1x1x256xf32>
    tpu.vector_store %arg5[%c0_22, %c1_23, %c0_24], %51 {strides = array<i32>} : memref<1x3x256xf32, #tpu.memory_space<vmem>>, vector<1x1x256xf32>,
    %52 = vector.extract_strided_slice %1 {offsets = [0, 0], sizes = [1, 256], strides = [1, 1]} : vector<4x256xf32> to vector<1x256xf32>
    %c2_25 = arith.constant 2 : index
    %c0_26 = arith.constant 0 : index
    %53 = memref.load %arg2[%c2_25, %c0_26] : memref<3x4xf32, #tpu.memory_space<smem>>
    %54 = vector.broadcast %53 : f32 to vector<1x256xf32>
    %55 = arith.mulf %52, %54 : vector<1x256xf32>
    %c2_27 = arith.constant 2 : index
    %c0_28 = arith.constant 0 : index
    %56 = memref.load %arg3[%c2_27, %c0_28] : memref<3x1xf32, #tpu.memory_space<smem>>
    %57 = vector.broadcast %56 : f32 to vector<1x256xf32>
    %58 = arith.addf %55, %57 : vector<1x256xf32>
    %59 = vector.extract_strided_slice %1 {offsets = [1, 0], sizes = [1, 256], strides = [1, 1]} : vector<4x256xf32> to vector<1x256xf32>
    %c2_29 = arith.constant 2 : index
    %c1_30 = arith.constant 1 : index
    %60 = memref.load %arg2[%c2_29, %c1_30] : memref<3x4xf32, #tpu.memory_space<smem>>
    %61 = vector.broadcast %60 : f32 to vector<1x256xf32>
    %62 = arith.mulf %59, %61 : vector<1x256xf32>
    %63 = arith.addf %58, %62 : vector<1x256xf32>
    %64 = vector.extract_strided_slice %1 {offsets = [2, 0], sizes = [1, 256], strides = [1, 1]} : vector<4x256xf32> to vector<1x256xf32>
    %c2_31 = arith.constant 2 : index
    %c2_32 = arith.constant 2 : index
    %65 = memref.load %arg2[%c2_31, %c2_32] : memref<3x4xf32, #tpu.memory_space<smem>>
    %66 = vector.broadcast %65 : f32 to vector<1x256xf32>
    %67 = arith.mulf %64, %66 : vector<1x256xf32>
    %68 = arith.addf %63, %67 : vector<1x256xf32>
    %69 = vector.extract_strided_slice %1 {offsets = [3, 0], sizes = [1, 256], strides = [1, 1]} : vector<4x256xf32> to vector<1x256xf32>
    %c2_33 = arith.constant 2 : index
    %c3_34 = arith.constant 3 : index
    %70 = memref.load %arg2[%c2_33, %c3_34] : memref<3x4xf32, #tpu.memory_space<smem>>
    %71 = vector.broadcast %70 : f32 to vector<1x256xf32>
    %72 = arith.mulf %69, %71 : vector<1x256xf32>
    %73 = arith.addf %68, %72 : vector<1x256xf32>
    %c0_35 = arith.constant 0 : index
    %c2_36 = arith.constant 2 : index
    %c0_37 = arith.constant 0 : index
    %74 = vector.load %arg5[%c0_35, %c2_36, %c0_37] : memref<1x3x256xf32, #tpu.memory_space<vmem>>, vector<1x1x256xf32>
    %75 = vector.shape_cast %74 : vector<1x1x256xf32> to vector<1x256xf32>
    %76 = vector.shape_cast %73 : vector<1x256xf32> to vector<1x1x256xf32>
    tpu.vector_store %arg5[%c0_35, %c2_36, %c0_37], %76 {strides = array<i32>} : memref<1x3x256xf32, #tpu.memory_space<vmem>>, vector<1x1x256xf32>,
    return
  }
  func.func @transform_0(%arg0: i32, %arg1: i32) -> (i32, i32) {
    %c0_i32 = arith.constant 0 : i32
    %c0_i32_0 = arith.constant 0 : i32
    %c0_i32_1 = arith.constant 0 : i32
    return %c0_i32, %c0_i32_0 : i32, i32
  }
  func.func @transform_1(%arg0: i32, %arg1: i32) -> (i32, i32) {
    %c0_i32 = arith.constant 0 : i32
    %c0_i32_0 = arith.constant 0 : i32
    %c0_i32_1 = arith.constant 0 : i32
    return %c0_i32, %c0_i32_0 : i32, i32
  }
  func.func @transform_2(%arg0: i32, %arg1: i32) -> (i32, i32, i32) {
    %c0_i32 = arith.constant 0 : i32
    %c0_i32_0 = arith.constant 0 : i32
    return %arg0, %c0_i32, %arg1 : i32, i32, i32
  }
  func.func @transform_3(%arg0: i32, %arg1: i32) -> (i32, i32, i32) {
    %c0_i32 = arith.constant 0 : i32
    %c0_i32_0 = arith.constant 0 : i32
    return %arg0, %c0_i32, %arg1 : i32, i32, i32
  }
}

</mosaic_0001>

<bundles_post_ra>
// kernel: tpu_custom_call.1
= control target key start
LH: loop header
LB: loop body
LE: loop exit
PB: predicated region body
PF: predicated region fallthrough
CT: control target
= control target key end

     0   :  { %8 = vsyncpa [#allocation4], 0  ;;  %s930_s0 = inlined_call_operand.vmem [shape: f32[3,4], index: 0, kind: input, shape index: {}]   ;;  %s931_s1 = inlined_call_operand.vmem [shape: f32[3,1], index: 1, kind: input, shape index: {}]   ;;  %s932_s2 = inlined_call_operand.hbm [shape: f32[2,4,256], index: 2, kind: input, shape index: {}]   ;;  %s933_s3 = inlined_call_operand.vmem [shape: f32[2,3,256], index: 3, kind: output, shape index: {}]  }
   0x1   :  { %9 = vsyncpa [#allocation6], 0 }
   0x2   :  { %10 = vsyncpa [#allocation3], 0 }
   0x3   :  { %12 = vsyncpa [#allocation3 + $0x1], 0  ;;  %s771_s12 = smov 0   ;;  %s773_s13 = smov 0  }
   0x4   :  { %s775_s14 = smov 0   ;;  %s777_s15 = smov 0  }
   0x5   :  { %s779_s16 = smov 0   ;;  %s781_s17 = smov 0  }
   0x6 LB: > { %s509_s18 = sadd.s32 4294967295, %s745_s17   ;;  %p94_p0 = scmp.ne.s32.totalorder %s729_s13, %s725_s12  ;;  %s745_s17 = sphi %s781_s17, %s18_s17   ;;  %s741_s16 = sphi %s779_s16, %s953_s16   ;;  %s737_s15 = sphi %s777_s15, %s952_s15   ;;  %s733_s14 = sphi %s775_s14, %s951_s14   ;;  %s729_s13 = sphi %s773_s13, %s950_s13   ;;  %s725_s12 = sphi %s771_s12, %s949_s12  }
   0x7   : > { %p801_p1 = scmp.eq.s32.totalorder %s509_s18, 0  ;;  %p511_p2 = scmp.ge.s32.totalorder %s745_s17, 1 }
   0x8   : > { %p133_p3 = scmp.lt.s32.totalorder %s745_s17, 3  ;;  %s146_s23 = sshll.u32 %s930_s0, 4  ;;  %s147_s23 = int_to_ptr.vmem [resolvable:$true] %s146_s23 }
   0x9   : > { %s938_s19 = scalar_select %p801_p1, 1, 0 }
   0xa   : > { %p809_p4 = por %p801_p1, %p94_p0  ;;  %p816_p5 = pnand %p511_p2, %p133_p3 }
   0xb   : > { %s157_s27 = sshll.u32 %s931_s1, 4  ;;  %s629_s29 = scalar_lea.vmem %s147_s23, 64  ;;  %s158_s27 = int_to_ptr.vmem [resolvable:$true] %s157_s27 }
   0xc   : > { %s939_s20 = scalar_select %p809_p4, 1, 0 }
   0xd   : > { %s940_s24 = scalar_select %p816_p5, 1, 0 }
   0xe   : > { %p562_p6 = pneg %p816_p5  ;;  %p630_p8 = scmp.ne.s32.totalorder %s147_s23, %s629_s29 }
   0xf   : > { %p637_p12 = scmp.lt.s32.totalorder %s147_s23, %s147_s23  ;;  %p638_p13 = scmp.lt.s32.totalorder %s629_s29, %s629_s29 }
  0x10   : > { %p827_p7 = pnand %p562_p6, %p801_p1 }
  0x11   : > { %p639_p0 = por %p638_p13, %p637_p12 }
  0x12   : > { %p631_p9 = pneg %p827_p7 }
  0x14   : > { %p632_p10 = pnand %p631_p9, %p630_p8 }
  0x16   : > { %p633_p11 = pneg %p632_p10 }
  0x18   : > { %p640_p2 = pnand %p639_p0, %p633_p11 }
  0x1a   : > { %643 = shalt.err (!%p640_p2)
}
  0x1b   : > { %s747_s30 = smov [#allocation2]   ;;  %s644_s4 = scalar_lea.vmem %s158_s27, 64 }
  0x1c   : > { %565 = dma.vmem_to_smem (!%p827_p7), %s147_s23, 64, %s747_s30, [#allocation4]  }
  0x1d   : > { %p645_p3 = scmp.ne.s32.totalorder %s158_s27, %s644_s4  ;;  %p652_p1 = scmp.lt.s32.totalorder %s158_s27, %s158_s27 }
  0x1e   : > { %p653_p5 = scmp.lt.s32.totalorder %s644_s4, %s644_s4 }
  0x1f   : > { %p647_p6 = pnand %p645_p3, %p631_p9 }
  0x20   : > { %p654_p8 = por %p653_p5, %p652_p1 }
  0x21   : > { %p648_p4 = pneg %p647_p6 }
  0x23   : > { %p655_p10 = pnand %p654_p8, %p648_p4 }
  0x25   : > { %658 = shalt.err (!%p655_p10)
}
  0x26   : > { %s748_s5 = smov [#allocation5]   ;;  %s30_s6 = sadd.s32 1, %s741_s16 }
  0x27   : > { %568 = dma.vmem_to_smem (!%p827_p7), %s158_s27, 64, %s748_s5, [#allocation6]  }
  0x28   : > { %s81_s7 = sadd.s32 1, %s733_s14  ;;  %p32_p9 = scmp.ge.s32.totalorder %s30_s6, 2 }
  0x29   : > { %p88_p1 = scmp.ne.s32.totalorder %s733_s14, %s729_s13  ;;  %p89_p4 = scmp.eq.s32.totalorder %s745_s17, 0 }
  0x2a   : > { %p575_p5 = scmp.lt.s32.totalorder %s745_s17, 2  ;;  %s955_s6 = smov (%p32_p9, %s30_s6), 0 }
  0x2b   : > { %p90_p11 = por %p89_p4, %p88_p1  ;;  %s168_s8 = sand.u32 1, %s733_s14  }
  0x2c   : > { %s76_s9 = ssub.s32 %s741_s16, %s955_s6  ;;  %s515_s10 = sshll.u32 %s168_s8, 3 }
  0x2d   : > { %p79_p12 = scmp.eq.s32.totalorder %s76_s9, 0  ;;  %s550_s11 = sshll.u32 %s741_s16, 7 }
  0x2e   : > { %s180_s22 = scalar_lea.hbm %s932_s2, %s550_s11  ;;  %s172_s23 = scalar_lea.vmem [#allocation7], %s515_s10 }
  0x2f   : > { %s850_s12 = scalar_select %p79_p12, %s733_s14, %s81_s7  }
  0x30   : > { %s182_s25 = sshll.u32 %s172_s23, 4  ;;  %p857_p7 = pnand %p575_p5, %p90_p11  ;;  %s183_s25 = int_to_ptr.vmem [resolvable:$true] %s182_s25 }
  0x31   : > { %s169_s27 = scalar_lea.sflag [#allocation3], %s168_s8  ;;  %s672_s28 = scalar_lea.vmem %s183_s25, 128 }
  0x32   : > { %p661_p13 = pneg %p857_p7  ;;  %p673_p0 = scmp.ne.s32.totalorder %s183_s25, %s672_s28 }
  0x33   : > { %s749_s29 = smov [#allocation7]  }
  0x34   : > { %p675_p2 = pnand %p673_p0, %p661_p13  ;;  %s677_s30 = sshll.u32 %s749_s29, 4  ;;  %s678_s30 = int_to_ptr.vmem [resolvable:$false] %s677_s30 }
  0x35   : > { %s679_s4 = scalar_lea.vmem %s678_s30, 256  ;;  %p680_p6 = scmp.lt.s32.totalorder %s183_s25, %s678_s30 }
  0x36   : > { %p676_p3 = pneg %p675_p2  ;;  %p681_p8 = scmp.lt.s32.totalorder %s679_s4, %s672_s28 }
  0x38   : > { %p682_p10 = por %p681_p8, %p680_p6 }
  0x3a   : > { %p683_p9 = pnand %p682_p10, %p676_p3 }
  0x3c   : > { %686 = shalt.err (!%p683_p9)
}
  0x3d   : > { %572 = dma.hbm_to_vmem [thread:$0]  (!%p857_p7), %s180_s22, 128, %s183_s25, %s169_s27  }
  0x3e   : > { %p943_p1 = scmp.ne.s32.totalorder %s940_s24, 0 }
  0x3f   : > { %p944_p4 = scmp.ne.s32.totalorder (!%p943_p1), %s938_s19, 0 }
  0x40   : > { %191 = sbr.rel (%p943_p1) target bundleno = 112 (0x70), region = 32 }
  0x45   : > { %712 = dma.done.wait (%p944_p4), [#allocation4], 64  }
  0x46   : > { %714 = vsyncadd (%p944_p4), [#allocation4], 4294967232 }
  0x47   : > { %716 = dma.done.wait (%p944_p4), [#allocation6], 64  }
  0x48   : > { %718 = vsyncadd (%p944_p4), [#allocation6], 4294967232  ;;  %s201_s5 = sand.u32 1, %s729_s13   ;;  %p945_p5 = scmp.ne.s32.totalorder %s939_s20, 0 }
  0x49   : > { %s521_s7 = sshll.u32 %s201_s5, 3  ;;  %s202_s8 = scalar_lea.sflag [#allocation3], %s201_s5 }
  0x4a   : > { %s205_s9 = scalar_lea.vmem [#allocation7], %s521_s7 }
  0x4b   : > { %720 = dma.done.wait (%p945_p5), %s202_s8, 128  }
  0x4c   : > { %722 = vsyncadd (%p945_p5), %s202_s8, 4294967168 }
  0x4d   : > { %210 = sfence }
  0x4e   : > { %p235_p11 = scmp.lt.s32.totalorder %s737_s15, 1  ;;  %s245_s24 = sld [smem:[#allocation2]]  ;;  %v884_v0 = vld [vmem:[%s205_s9] sm:$0xff]  ;;  %v279_v4 = vlaneseq  ;;  %v750_v5 = vmov 1966171168  }
  0x4f   : > { %s248_s10 = sld [smem:[#allocation5]]  ;;  %v277_v6 = vunpack.c.l.s4 %v750_v5 }
  0x50   : > { %s957_s15 = smov (!%p235_p11, %s737_s15), 1  ;;  %s524_s19 = sld [smem:[#allocation2 + $0x1]]  ;;  %v280_v13 = vshrl.u32 %v279_v4, 7  ;;  %vm900_vm0 = vcmp.lt.s32.totalorder %v279_v4, 256 }
  0x51   : > { %s526_s11 = sld [smem:[#allocation2 + $0x2]]  ;;  %v278_v16 = vunpack.c.0.s8 %v277_v6  ;;  %s551_s4 = sshll.u32 %s957_s15, 3 }
  0x52   : > { %s528_s18 = sld [smem:[#allocation2 + $0x3]]  ;;  %s242_s8 = scalar_lea.vmem %s933_s3, %s551_s4 }
  0x53   : > { %s530_s21 = sld [smem:[#allocation2 + $0x80]]  ;;  %v281_v28 = vsub.s32 %v278_v16, %v280_v13 }
  0x54   : > { %v246_v1 = vstv %s245_s24  ;;  %s531_s20 = sld [smem:[#allocation5 + $0x80]] }
  0x55   : > { %v247_v2 = vmul.f32 %v246_v1, %v884_v0  ;;  %v249_v3 = vstv %s248_s10  ;;  %s532_s22 = sld [smem:[#allocation2 + $0x81]] }
  0x56   : > { %v252_v7 = vstv %s524_s19  ;;  %s534_s23 = sld [smem:[#allocation2 + $0x82]] }
  0x57   : > { %v250_v8 = vadd.f32 %v249_v3, %v247_v2  ;;  %v253_v9 = vmul.f32 %v252_v7, %v884_v0  ;;  %v260_v10 = vstv %s526_s11  ;;  %s536_s25 = sld [smem:[#allocation2 + $0x83]] }
  0x58   : > { %v261_v11 = vmul.f32 %v260_v10, %v884_v0  ;;  %v268_v12 = vstv %s528_s18  ;;  %s539_s26 = sld [smem:[#allocation2 + $0x100]] }
  0x59   : > { %v525_v14 = vrot.slane %v253_v9, 9  ;;  %v269_v15 = vmul.f32 %v268_v12, %v884_v0  ;;  %v297_v17 = vstv %s530_s21  ;;  %s540_s27 = sld [smem:[#allocation5 + $0x100]] }
  0x5a   : > { %v527_v18 = vrot.slane %v261_v11, 10  ;;  %v298_v19 = vmul.f32 %v297_v17, %v884_v0  ;;  %v300_v20 = vstv %s531_s20  ;;  %s541_s28 = sld [smem:[#allocation2 + $0x101]] }
  0x5b   : > { %v258_v21 = vadd.f32 %v525_v14, %v250_v8  ;;  %v529_v22 = vrot.slane %v269_v15, 11  ;;  %v303_v23 = vstv %s532_s22  ;;  %s543_s29 = sld [smem:[#allocation2 + $0x102]] }
  0x5c   : > { %v301_v24 = vadd.f32 %v300_v20, %v298_v19  ;;  %v304_v25 = vmul.f32 %v303_v23, %v884_v0  ;;  %v311_v26 = vstv %s534_s23  ;;  %s545_s30 = sld [smem:[#allocation2 + $0x103]] }
  0x5d   : > { %v266_v27 = vadd.f32 %v527_v18, %v258_v21  ;;  %v312_v29 = vmul.f32 %v311_v26, %v884_v0  ;;  %v319_v30 = vstv %s536_s25 }
  0x5e   : > { %v533_v31 = vrot.slane %v304_v25, 9  ;;  %v320_v32 = vmul.f32 %v319_v30, %v884_v0  ;;  %v345_v33 = vstv %s539_s26 }
  0x5f   : > { %v274_v34 = vadd.f32 %v529_v22, %v266_v27  ;;  %v535_v35 = vrot.slane %v312_v29, 10  ;;  %v346_v36 = vmul.f32 %v345_v33, %v884_v0  ;;  %v348_v37 = vstv %s540_s27 }
  0x60   : > { %v309_v38 = vadd.f32 %v533_v31, %v301_v24  ;;  %v537_v39 = vrot.slane %v320_v32, 11  ;;  %v351_v40 = vstv %s541_s28 }
  0x61   : > { %v282_v41 = vrot.slane %v274_v34, %v281_v28  ;;  %v349_v42 = vadd.f32 %v348_v37, %v346_v36  ;;  %v352_v43 = vmul.f32 %v351_v40, %v884_v0  ;;  %v359_v44 = vstv %s543_s29 }
  0x62   : > { %v317_v46 = vadd.f32 %v535_v35, %v309_v38  ;;  %v360_v47 = vmul.f32 %v359_v44, %v884_v0  ;;  %v367_v48 = vstv %s545_s30 }
  0x63   : > { %v289_v49 = vrot.slane %v282_v41, %v281_v28  ;;  %v542_v50 = vrot.slane %v352_v43, 9  ;;  %v368_v51 = vmul.f32 %v367_v48, %v884_v0 }
  0x64   : > { %v325_v52 = vadd.f32 %v537_v39, %v317_v46  ;;  %v544_v53 = vrot.slane %v360_v47, 10 }
  0x65   : > { %295 = vst.msk [vmem:[%s242_s8] ss:$4 sm:$0x3] %vm900_vm0, %v289_v49  ;;  %v357_v54 = vadd.f32 %v542_v50, %v349_v42  ;;  %v546_v55 = vrot.slane %v368_v51, 11 }
  0x66   : > { %v333_v56 = vrot.slane %v325_v52, %v281_v28 }
  0x67   : > { %v365_v57 = vadd.f32 %v544_v53, %v357_v54 }
  0x68   : > { %v340_v58 = vrot.slane %v333_v56, %v281_v28 }
  0x69   : > { %v373_v59 = vadd.f32 %v546_v55, %v365_v57 }
  0x6a   : > { %538 = vst.msk [vmem:[%s242_s8 + $0x1] ss:$4 sm:$0x3] %vm900_vm0, %v340_v58 }
  0x6b   : > { %v381_v60 = vrot.slane %v373_v59, %v281_v28 }
  0x6d   : > { %v388_v61 = vrot.slane %v381_v60, %v281_v28 }
  0x6f   : > { %547 = vst.msk [vmem:[%s242_s8 + $0x2] ss:$4 sm:$0x3] %vm900_vm0, %v388_v61 }
  0x70 PF: > { %s18_s17 = sadd.s32 1, %s745_s17   ;;  %s948_s15 = smov %s850_s12 }
  0x71   : > { %p15_p12 = scmp.ge.s32.totalorder %s18_s17, 4   ;;  %s949_s12 = smov %s729_s13 }
  0x72   : > { %s950_s13 = smov %s733_s14  ;;  %s951_s14 = smov %s948_s15 }
  0x73   : > { %s952_s15 = smov %s741_s16  ;;  %s953_s16 = smov %s955_s6 }
  0x74   :  { %17 = sbr.rel (!%p15_p12) target bundleno = 6 (0x6), region = 83 }
  0x79   :  { %422 = vsyncpa [#allocation3], 1 }
  0x7a   :  { %424 = vsyncpa [#allocation3 + $0x1], 1 }
  0x7b   :  { %425 = vsyncpa [#allocation4], 1 }
  0x7c   :  { %427 = vsyncpa [#allocation4 + $0x1], 1 }
  0x7d   :  { %428 = vsyncpa [#allocation6], 1 }

</bundles_post_ra>
